<compile_context>
chip_gen: v7x
topology: tpu7x:2x2x1
jax: 0.10.0
libtpu: 0.0.40
codegen_flags: <defaults>
</compile_context>

<pallas_src>
import functools

import jax
import jax.numpy as jnp
from jax import lax
from jax.experimental import pallas as pl
from jax.experimental.pallas import tpu as pltpu


def _electra_output_kernel(x_ref, w_ref, b_ref, res_ref, g_ref, beta_ref,
                           o_ref, *, eps, n_chunks):
    w = w_ref[...]
    if w.dtype != jnp.bfloat16:
        w = w.astype(jnp.bfloat16)
    bias = b_ref[...].astype(jnp.float32)
    gamma = g_ref[...].astype(jnp.float32)
    beta = beta_ref[...].astype(jnp.float32)

    tm = x_ref.shape[0]
    cm = tm // n_chunks
    inv_n = 1.0 / float(o_ref.shape[-1])

    # Stage 1: issue every chunk's matmul to the MXU (bf16 operands, f32 acc).
    accs = []
    for c in range(n_chunks):
        xs = x_ref[c * cm:(c + 1) * cm, :].astype(jnp.bfloat16)
        accs.append(jnp.dot(xs, w, preferred_element_type=jnp.float32))

    # Stage 2: fused bias + residual + LayerNorm per chunk, all in f32.
    # Chunk c's VPU/XLU/EUP work can overlap the MXU tail of chunk c+1.
    for c in range(n_chunks):
        acc = accs[c] + bias
        acc = acc + res_ref[c * cm:(c + 1) * cm, :].astype(jnp.float32)
        mean = jnp.sum(acc, axis=-1, keepdims=True) * inv_n       # XLU reduce
        xc = acc - mean
        var = jnp.sum(xc * xc, axis=-1, keepdims=True) * inv_n    # XLU reduce
        inv = lax.rsqrt(var + eps)                                # EUP slot
        y = xc * inv * gamma + beta
        o_ref[c * cm:(c + 1) * cm, :] = y.astype(o_ref.dtype)


def prepare_electra_output_weight(weight):
    """One-time prep: PyTorch nn.Linear weight [N, K] -> [K, N] bf16."""
    return weight.T.astype(jnp.bfloat16)


def _round_up(x, m):
    return ((x + m - 1) // m) * m


def _vmem_budget_bytes():
    cap = 64 * 1024 * 1024  # conservative default = v7x per-TC physical VMEM
    try:
        info = pltpu.get_tpu_info()
        cap = int(getattr(info, "vmem_capacity_bytes", cap))
    except Exception:
        pass
    # ~48 MiB on v7x, ~96 MiB on v5e/v6e: leave headroom for scratch / DMA.
    return (cap * 3) // 4


def _choose_tm(M, K, N, x_bytes, res_bytes, out_bytes, budget):
    # Bigger row-slabs where VMEM is plentiful (v5e/v6e), smaller on v7x.
    tm = 512 if budget >= 72 * 1024 * 1024 else 256
    tm = min(tm, _round_up(M, 8))
    if M >= 16:
        # Ensure >= 2 grid steps so both v7x TensorCores get work.
        tm = min(tm, _round_up(pl.cdiv(M, 2), 8))
    tm = max(tm, 8)

    def footprint(t):
        return (K * N * 2                        # resident bf16 weight (1 buf)
                + 2 * t * K * x_bytes            # activation tiles (2 bufs)
                + 2 * t * N * res_bytes          # residual tiles
                + 2 * t * N * out_bytes          # output tiles
                + 6 * _round_up(N, 128) * 4      # bias / gamma / beta
                + (2 << 20))                     # slack

    while tm > 8 and footprint(tm) > budget:
        tm -= 8
    return tm


def electra_output_forward(hidden_states, input_tensor, w_kn, bias,
                           ln_gamma, ln_beta, *, eps=1e-12):
    """Fused ElectraOutput forward.

    hidden_states : [B, S, K]   (K = intermediate_size)
    input_tensor  : [B, S, N]   (N = hidden_size) residual
    w_kn          : [K, N]      pre-transposed dense weight (bf16 preferred;
                                see prepare_electra_output_weight)
    bias, ln_gamma, ln_beta : [N]
    returns       : [B, S, N]
    """
    # TODO(synk): dropout (hidden_dropout_prob) omitted — inference-mode
    # forward; for training, draw a mask with pltpu.prng_random_bits.
    B, S, K = hidden_states.shape
    Kw, N = w_kn.shape
    assert Kw == K
    assert input_tensor.shape == (B, S, N)
    out_dtype = input_tensor.dtype

    M = B * S
    x2d = hidden_states.reshape(M, K)
    res2d = input_tensor.reshape(M, N)
    b_2d = bias.reshape(1, N)
    g_2d = ln_gamma.reshape(1, N)
    be_2d = ln_beta.reshape(1, N)

    budget = _vmem_budget_bytes()
    tm = _choose_tm(M, K, N,
                    jnp.dtype(hidden_states.dtype).itemsize,
                    jnp.dtype(input_tensor.dtype).itemsize,
                    jnp.dtype(out_dtype).itemsize,
                    budget)
    n_chunks = 2 if (tm >= 16 and tm % 16 == 0) else 1
    grid = (pl.cdiv(M, tm),)   # ragged last M block handled by Pallas; no pad

    kernel = functools.partial(_electra_output_kernel, eps=float(eps),
                               n_chunks=n_chunks)

    cost = pl.CostEstimate(
        flops=2 * M * K * N,
        transcendentals=0,
        bytes_accessed=(M * K * jnp.dtype(hidden_states.dtype).itemsize
                        + K * N * jnp.dtype(w_kn.dtype).itemsize
                        + M * N * jnp.dtype(input_tensor.dtype).itemsize
                        + M * N * jnp.dtype(out_dtype).itemsize),
    )

    def build(const_mode):
        def cspec(shape):
            if const_mode is None:
                return pl.BlockSpec(shape, lambda i: (0, 0))
            return pl.BlockSpec(shape, lambda i: (0, 0),
                                pipeline_mode=const_mode)

        return pl.pallas_call(
            kernel,
            out_shape=jax.ShapeDtypeStruct((M, N), out_dtype),
            grid_spec=pltpu.PrefetchScalarGridSpec(
                num_scalar_prefetch=0,
                grid=grid,
                in_specs=[
                    pl.BlockSpec((tm, K), lambda i: (i, 0)),   # activations
                    cspec((K, N)),                             # weight (VMEM-resident)
                    cspec((1, N)),                             # bias
                    pl.BlockSpec((tm, N), lambda i: (i, 0)),   # residual
                    cspec((1, N)),                             # gamma
                    cspec((1, N)),                             # beta
                ],
                out_specs=pl.BlockSpec((tm, N), lambda i: (i, 0)),
            ),
            compiler_params=pltpu.CompilerParams(
                dimension_semantics=("parallel",),
                vmem_limit_bytes=budget,
            ),
            cost_estimate=cost,
        )

    args = (x2d, w_kn, b_2d, res2d, g_2d, be_2d)
    try:
        # Constant-index_map operands single-buffered (they never change).
        out2d = build(pl.Buffered(1))(*args)
    except Exception:  # pragma: no cover — fall back to default buffering
        out2d = build(None)(*args)

    return out2d.reshape(B, S, N)


def _reference(hidden_states, input_tensor, weight, bias, gamma, beta, eps):
    x = hidden_states.astype(jnp.float32)
    h = x @ weight.T.astype(jnp.float32) + bias.astype(jnp.float32)
    h = h + input_tensor.astype(jnp.float32)
    mean = jnp.mean(h, axis=-1, keepdims=True)
    var = jnp.mean((h - mean) ** 2, axis=-1, keepdims=True)
    y = (h - mean) * lax.rsqrt(var + eps)
    return (y * gamma.astype(jnp.float32) + beta.astype(jnp.float32)).astype(
        input_tensor.dtype)


if __name__ == "__main__":
    # Small, TPU-friendly shapes consistent with ElectraOutput:
    #   intermediate_size K = 512, hidden_size N = 128, batch=2, seq=8.
    B, S, K, N = 2, 8, 512, 128
    eps = 1e-12
    key = jax.random.PRNGKey(0)
    k1, k2, k3, k4, k5, k6 = jax.random.split(key, 6)

    hidden_states = jax.random.normal(k1, (B, S, K), dtype=jnp.float32)
    input_tensor = jax.random.normal(k2, (B, S, N), dtype=jnp.float32)
    weight = jax.random.normal(k3, (N, K), dtype=jnp.float32) * 0.02
    bias = jax.random.normal(k4, (N,), dtype=jnp.float32) * 0.02
    gamma = 1.0 + 0.1 * jax.random.normal(k5, (N,), dtype=jnp.float32)
    beta = 0.1 * jax.random.normal(k6, (N,), dtype=jnp.float32)

    # One-time weight prep (transpose + bf16 cast) hoisted out of the forward.
    w_kn = prepare_electra_output_weight(weight)

    out = electra_output_forward(hidden_states, input_tensor, w_kn, bias,
                                 gamma, beta, eps=eps)
    out = jax.block_until_ready(out)

    ref = _reference(hidden_states, input_tensor, weight, bias, gamma, beta,
                     eps)
    assert out.shape == (B, S, N)
    # bf16 MXU operands (f32 accumulation): tolerance loosened vs f32 ref.
    assert jnp.allclose(out, ref, atol=2e-2, rtol=2e-2), (
        float(jnp.max(jnp.abs(out - ref))))

    print("KERNEL_OK")
</pallas_src>

<mosaic_0001>
module attributes {stable_mosaic.version = 11 : i64} {
  func.func @_electra_output_kernel(%arg0: i32, %arg1: memref<8x512xf32, #tpu.memory_space<vmem>>, %arg2: memref<512x128xbf16, #tpu.memory_space<vmem>>, %arg3: memref<1x128xf32, #tpu.memory_space<vmem>>, %arg4: memref<8x128xf32, #tpu.memory_space<vmem>>, %arg5: memref<1x128xf32, #tpu.memory_space<vmem>>, %arg6: memref<1x128xf32, #tpu.memory_space<vmem>>, %arg7: memref<8x128xf32, #tpu.memory_space<vmem>>) attributes {dimension_semantics = [#tpu.dimension_semantics<parallel>], iteration_bounds = array<i64: 2>, scalar_prefetch = 0 : i64, scratch_operands = 0 : i64, tpu.core_type = #tpu.core_type<tc>, window_params = [{transform_indices = @transform_0, window_bounds = array<i64: 8, 512>}, {pipeline_mode = #tpu.pipeline_mode<synchronous>, transform_indices = @transform_1, window_bounds = array<i64: 512, 128>}, {pipeline_mode = #tpu.pipeline_mode<synchronous>, transform_indices = @transform_2, window_bounds = array<i64: 1, 128>}, {transform_indices = @transform_3, window_bounds = array<i64: 8, 128>}, {pipeline_mode = #tpu.pipeline_mode<synchronous>, transform_indices = @transform_4, window_bounds = array<i64: 1, 128>}, {pipeline_mode = #tpu.pipeline_mode<synchronous>, transform_indices = @transform_5, window_bounds = array<i64: 1, 128>}, {transform_indices = @transform_6, window_bounds = array<i64: 8, 128>}]} {
    %c0 = arith.constant 0 : index
    %c0_0 = arith.constant 0 : index
    %0 = vector.load %arg2[%c0, %c0_0] : memref<512x128xbf16, #tpu.memory_space<vmem>>, vector<512x128xbf16>
    %c0_1 = arith.constant 0 : index
    %c0_2 = arith.constant 0 : index
    %1 = vector.load %arg3[%c0_1, %c0_2] : memref<1x128xf32, #tpu.memory_space<vmem>>, vector<1x128xf32>
    %c0_3 = arith.constant 0 : index
    %c0_4 = arith.constant 0 : index
    %2 = vector.load %arg5[%c0_3, %c0_4] : memref<1x128xf32, #tpu.memory_space<vmem>>, vector<1x128xf32>
    %c0_5 = arith.constant 0 : index
    %c0_6 = arith.constant 0 : index
    %3 = vector.load %arg6[%c0_5, %c0_6] : memref<1x128xf32, #tpu.memory_space<vmem>>, vector<1x128xf32>
    %c0_7 = arith.constant 0 : index
    %c0_8 = arith.constant 0 : index
    %4 = vector.load %arg1[%c0_7, %c0_8] : memref<8x512xf32, #tpu.memory_space<vmem>>, vector<8x512xf32>
    %5 = arith.truncf %4 : vector<8x512xf32> to vector<8x512xbf16>
    %cst = arith.constant dense<0.000000e+00> : vector<8x128xf32>
    %6 = tpu.matmul %5, %0, %cst {dimension_numbers = #tpu.dot_dimension_numbers<[1], [0], [0], [1], [0, 0, 1, 1], [], []>} : vector<8x512xbf16>, vector<512x128xbf16>, vector<8x128xf32> -> vector<8x128xf32>
    %7 = vector.broadcast %1 : vector<1x128xf32> to vector<8x128xf32>
    %8 = arith.addf %6, %7 : vector<8x128xf32>
    %c0_9 = arith.constant 0 : index
    %c0_10 = arith.constant 0 : index
    %9 = vector.load %arg4[%c0_9, %c0_10] : memref<8x128xf32, #tpu.memory_space<vmem>>, vector<8x128xf32>
    %10 = arith.addf %8, %9 : vector<8x128xf32>
    %cst_11 = arith.constant dense<0.000000e+00> : vector<8xf32>
    %11 = vector.multi_reduction <add>, %10, %cst_11 [1] : vector<8x128xf32> to vector<8xf32>
    %12 = vector.shape_cast %11 : vector<8xf32> to vector<8x1xf32>
    %cst_12 = arith.constant 7.812500e-03 : f32
    %13 = vector.broadcast %cst_12 : f32 to vector<8x1xf32>
    %14 = arith.mulf %12, %13 : vector<8x1xf32>
    %15 = vector.broadcast %14 : vector<8x1xf32> to vector<8x128xf32>
    %16 = arith.subf %10, %15 : vector<8x128xf32>
    %17 = arith.mulf %16, %16 : vector<8x128xf32>
    %cst_13 = arith.constant dense<0.000000e+00> : vector<8xf32>
    %18 = vector.multi_reduction <add>, %17, %cst_13 [1] : vector<8x128xf32> to vector<8xf32>
    %19 = vector.shape_cast %18 : vector<8xf32> to vector<8x1xf32>
    %cst_14 = arith.constant 7.812500e-03 : f32
    %20 = vector.broadcast %cst_14 : f32 to vector<8x1xf32>
    %21 = arith.mulf %19, %20 : vector<8x1xf32>
    %cst_15 = arith.constant 9.99999996E-13 : f32
    %22 = vector.broadcast %cst_15 : f32 to vector<8x1xf32>
    %23 = arith.addf %21, %22 : vector<8x1xf32>
    %24 = math.rsqrt %23 : vector<8x1xf32>
    %25 = vector.broadcast %24 : vector<8x1xf32> to vector<8x128xf32>
    %26 = arith.mulf %16, %25 : vector<8x128xf32>
    %27 = vector.broadcast %2 : vector<1x128xf32> to vector<8x128xf32>
    %28 = arith.mulf %26, %27 : vector<8x128xf32>
    %29 = vector.broadcast %3 : vector<1x128xf32> to vector<8x128xf32>
    %30 = arith.addf %28, %29 : vector<8x128xf32>
    %c0_16 = arith.constant 0 : index
    %c0_17 = arith.constant 0 : index
    %31 = vector.load %arg7[%c0_16, %c0_17] : memref<8x128xf32, #tpu.memory_space<vmem>>, vector<8x128xf32>
    tpu.vector_store %arg7[%c0_16, %c0_17], %30 {strides = array<i32>} : memref<8x128xf32, #tpu.memory_space<vmem>>, vector<8x128xf32>,
    return
  }
  func.func @transform_0(%arg0: i32) -> (i32, i32) {
    %c0_i32 = arith.constant 0 : i32
    %c0_i32_0 = arith.constant 0 : i32
    return %arg0, %c0_i32 : i32, i32
  }
  func.func @transform_1(%arg0: i32) -> (i32, i32) {
    %c0_i32 = arith.constant 0 : i32
    %c0_i32_0 = arith.constant 0 : i32
    %c0_i32_1 = arith.constant 0 : i32
    return %c0_i32, %c0_i32_0 : i32, i32
  }
  func.func @transform_2(%arg0: i32) -> (i32, i32) {
    %c0_i32 = arith.constant 0 : i32
    %c0_i32_0 = arith.constant 0 : i32
    %c0_i32_1 = arith.constant 0 : i32
    return %c0_i32, %c0_i32_0 : i32, i32
  }
  func.func @transform_3(%arg0: i32) -> (i32, i32) {
    %c0_i32 = arith.constant 0 : i32
    %c0_i32_0 = arith.constant 0 : i32
    return %arg0, %c0_i32 : i32, i32
  }
  func.func @transform_4(%arg0: i32) -> (i32, i32) {
    %c0_i32 = arith.constant 0 : i32
    %c0_i32_0 = arith.constant 0 : i32
    %c0_i32_1 = arith.constant 0 : i32
    return %c0_i32, %c0_i32_0 : i32, i32
  }
  func.func @transform_5(%arg0: i32) -> (i32, i32) {
    %c0_i32 = arith.constant 0 : i32
    %c0_i32_0 = arith.constant 0 : i32
    %c0_i32_1 = arith.constant 0 : i32
    return %c0_i32, %c0_i32_0 : i32, i32
  }
  func.func @transform_6(%arg0: i32) -> (i32, i32) {
    %c0_i32 = arith.constant 0 : i32
    %c0_i32_0 = arith.constant 0 : i32
    return %arg0, %c0_i32 : i32, i32
  }
}

module attributes {stable_mosaic.version = 11 : i64} {
  func.func @_electra_output_kernel(%arg0: i32, %arg1: memref<8x512xf32, #tpu.memory_space<vmem>>, %arg2: memref<512x128xbf16, #tpu.memory_space<vmem>>, %arg3: memref<1x128xf32, #tpu.memory_space<vmem>>, %arg4: memref<8x128xf32, #tpu.memory_space<vmem>>, %arg5: memref<1x128xf32, #tpu.memory_space<vmem>>, %arg6: memref<1x128xf32, #tpu.memory_space<vmem>>, %arg7: memref<8x128xf32, #tpu.memory_space<vmem>>) attributes {dimension_semantics = [#tpu.dimension_semantics<parallel>], iteration_bounds = array<i64: 2>, scalar_prefetch = 0 : i64, scratch_operands = 0 : i64, tpu.core_type = #tpu.core_type<tc>, window_params = [{transform_indices = @transform_0, window_bounds = array<i64: 8, 512>}, {pipeline_mode = #tpu.pipeline_mode<synchronous>, transform_indices = @transform_1, window_bounds = array<i64: 512, 128>}, {pipeline_mode = #tpu.pipeline_mode<synchronous>, transform_indices = @transform_2, window_bounds = array<i64: 1, 128>}, {transform_indices = @transform_3, window_bounds = array<i64: 8, 128>}, {pipeline_mode = #tpu.pipeline_mode<synchronous>, transform_indices = @transform_4, window_bounds = array<i64: 1, 128>}, {pipeline_mode = #tpu.pipeline_mode<synchronous>, transform_indices = @transform_5, window_bounds = array<i64: 1, 128>}, {transform_indices = @transform_6, window_bounds = array<i64: 8, 128>}]} {
    %c0 = arith.constant 0 : index
    %c0_0 = arith.constant 0 : index
    %0 = vector.load %arg2[%c0, %c0_0] : memref<512x128xbf16, #tpu.memory_space<vmem>>, vector<512x128xbf16>
    %c0_1 = arith.constant 0 : index
    %c0_2 = arith.constant 0 : index
    %1 = vector.load %arg3[%c0_1, %c0_2] : memref<1x128xf32, #tpu.memory_space<vmem>>, vector<1x128xf32>
    %c0_3 = arith.constant 0 : index
    %c0_4 = arith.constant 0 : index
    %2 = vector.load %arg5[%c0_3, %c0_4] : memref<1x128xf32, #tpu.memory_space<vmem>>, vector<1x128xf32>
    %c0_5 = arith.constant 0 : index
    %c0_6 = arith.constant 0 : index
    %3 = vector.load %arg6[%c0_5, %c0_6] : memref<1x128xf32, #tpu.memory_space<vmem>>, vector<1x128xf32>
    %c0_7 = arith.constant 0 : index
    %c0_8 = arith.constant 0 : index
    %4 = vector.load %arg1[%c0_7, %c0_8] : memref<8x512xf32, #tpu.memory_space<vmem>>, vector<8x512xf32>
    %5 = arith.truncf %4 : vector<8x512xf32> to vector<8x512xbf16>
    %cst = arith.constant dense<0.000000e+00> : vector<8x128xf32>
    %6 = tpu.matmul %5, %0, %cst {dimension_numbers = #tpu.dot_dimension_numbers<[1], [0], [0], [1], [0, 0, 1, 1], [], []>} : vector<8x512xbf16>, vector<512x128xbf16>, vector<8x128xf32> -> vector<8x128xf32>
    %7 = vector.broadcast %1 : vector<1x128xf32> to vector<8x128xf32>
    %8 = arith.addf %6, %7 : vector<8x128xf32>
    %c0_9 = arith.constant 0 : index
    %c0_10 = arith.constant 0 : index
    %9 = vector.load %arg4[%c0_9, %c0_10] : memref<8x128xf32, #tpu.memory_space<vmem>>, vector<8x128xf32>
    %10 = arith.addf %8, %9 : vector<8x128xf32>
    %cst_11 = arith.constant dense<0.000000e+00> : vector<8xf32>
    %11 = vector.multi_reduction <add>, %10, %cst_11 [1] : vector<8x128xf32> to vector<8xf32>
    %12 = vector.shape_cast %11 : vector<8xf32> to vector<8x1xf32>
    %cst_12 = arith.constant 7.812500e-03 : f32
    %13 = vector.broadcast %cst_12 : f32 to vector<8x1xf32>
    %14 = arith.mulf %12, %13 : vector<8x1xf32>
    %15 = vector.broadcast %14 : vector<8x1xf32> to vector<8x128xf32>
    %16 = arith.subf %10, %15 : vector<8x128xf32>
    %17 = arith.mulf %16, %16 : vector<8x128xf32>
    %cst_13 = arith.constant dense<0.000000e+00> : vector<8xf32>
    %18 = vector.multi_reduction <add>, %17, %cst_13 [1] : vector<8x128xf32> to vector<8xf32>
    %19 = vector.shape_cast %18 : vector<8xf32> to vector<8x1xf32>
    %cst_14 = arith.constant 7.812500e-03 : f32
    %20 = vector.broadcast %cst_14 : f32 to vector<8x1xf32>
    %21 = arith.mulf %19, %20 : vector<8x1xf32>
    %cst_15 = arith.constant 9.99999996E-13 : f32
    %22 = vector.broadcast %cst_15 : f32 to vector<8x1xf32>
    %23 = arith.addf %21, %22 : vector<8x1xf32>
    %24 = math.rsqrt %23 : vector<8x1xf32>
    %25 = vector.broadcast %24 : vector<8x1xf32> to vector<8x128xf32>
    %26 = arith.mulf %16, %25 : vector<8x128xf32>
    %27 = vector.broadcast %2 : vector<1x128xf32> to vector<8x128xf32>
    %28 = arith.mulf %26, %27 : vector<8x128xf32>
    %29 = vector.broadcast %3 : vector<1x128xf32> to vector<8x128xf32>
    %30 = arith.addf %28, %29 : vector<8x128xf32>
    %c0_16 = arith.constant 0 : index
    %c0_17 = arith.constant 0 : index
    %31 = vector.load %arg7[%c0_16, %c0_17] : memref<8x128xf32, #tpu.memory_space<vmem>>, vector<8x128xf32>
    tpu.vector_store %arg7[%c0_16, %c0_17], %30 {strides = array<i32>} : memref<8x128xf32, #tpu.memory_space<vmem>>, vector<8x128xf32>,
    return
  }
  func.func @transform_0(%arg0: i32) -> (i32, i32) {
    %c0_i32 = arith.constant 0 : i32
    %c0_i32_0 = arith.constant 0 : i32
    return %arg0, %c0_i32 : i32, i32
  }
  func.func @transform_1(%arg0: i32) -> (i32, i32) {
    %c0_i32 = arith.constant 0 : i32
    %c0_i32_0 = arith.constant 0 : i32
    %c0_i32_1 = arith.constant 0 : i32
    return %c0_i32, %c0_i32_0 : i32, i32
  }
  func.func @transform_2(%arg0: i32) -> (i32, i32) {
    %c0_i32 = arith.constant 0 : i32
    %c0_i32_0 = arith.constant 0 : i32
    %c0_i32_1 = arith.constant 0 : i32
    return %c0_i32, %c0_i32_0 : i32, i32
  }
  func.func @transform_3(%arg0: i32) -> (i32, i32) {
    %c0_i32 = arith.constant 0 : i32
    %c0_i32_0 = arith.constant 0 : i32
    return %arg0, %c0_i32 : i32, i32
  }
  func.func @transform_4(%arg0: i32) -> (i32, i32) {
    %c0_i32 = arith.constant 0 : i32
    %c0_i32_0 = arith.constant 0 : i32
    %c0_i32_1 = arith.constant 0 : i32
    return %c0_i32, %c0_i32_0 : i32, i32
  }
  func.func @transform_5(%arg0: i32) -> (i32, i32) {
    %c0_i32 = arith.constant 0 : i32
    %c0_i32_0 = arith.constant 0 : i32
    %c0_i32_1 = arith.constant 0 : i32
    return %c0_i32, %c0_i32_0 : i32, i32
  }
  func.func @transform_6(%arg0: i32) -> (i32, i32) {
    %c0_i32 = arith.constant 0 : i32
    %c0_i32_0 = arith.constant 0 : i32
    return %arg0, %c0_i32 : i32, i32
  }
}

</mosaic_0001>

<bundles_post_ra>
// kernel: tpu_custom_call.1
= control target key start
LH: loop header
LB: loop body
LE: loop exit
PB: predicated region body
PF: predicated region fallthrough
CT: control target
= control target key end

     0   :  { %s1480_s0 = inlined_call_operand.hbm [shape: f32[16,512], index: 0, kind: input, shape index: {}]   ;;  %s1481_s1 = inlined_call_operand.hbm [shape: bf16[512,128], index: 1, kind: input, shape index: {}]   ;;  %s1482_s2 = inlined_call_operand.vmem [shape: f32[1,128], index: 2, kind: input, shape index: {}]   ;;  %s1483_s3 = inlined_call_operand.hbm [shape: f32[16,128], index: 3, kind: input, shape index: {}]   ;;  %s1484_s4 = inlined_call_operand.vmem [shape: f32[1,128], index: 4, kind: input, shape index: {}]   ;;  %s1485_s5 = inlined_call_operand.vmem [shape: f32[1,128], index: 5, kind: input, shape index: {}]   ;;  %s1486_s6 = inlined_call_operand.hbm [shape: f32[16,128], index: 6, kind: output, shape index: {}]  }
   0x1   :  { %1495 = sst [smem:[#allocation15_spill]] %s1480_s0 }
   0x2   :  { %11 = vsyncpa [#allocation3], 0 }
   0x3   :  { %13 = vsyncpa [#allocation3 + $0x1], 0 }
   0x4   :  { %14 = vsyncpa [#allocation6], 0 }
   0x5   :  { %15 = vsyncpa [#allocation4], 0 }
   0x6   :  { %17 = vsyncpa [#allocation4 + $0x1], 0  ;;  %s1214_s21 = smov 0   ;;  %s1216_s22 = smov 0  }
   0x7   :  { %s1218_s23 = smov 0   ;;  %s1220_s24 = smov 0  }
   0x8 LB: > { %1496 = sst [smem:[#allocation13_spill]] %s1167_s23  ;;  %s1235_s25 = sadd.s32 1, %s1171_s24   ;;  %s1171_s24 = sphi %s1220_s24, %s1519_s24   ;;  %s1167_s23 = sphi %s1218_s23, %s1516_s23   ;;  %s1163_s22 = sphi %s1216_s22, %s1518_s22   ;;  %s1159_s21 = sphi %s1214_s21, %s1517_s21  }
   0x9   : > { %s30_s26 = sadd.s32 1, %s1167_s23  ;;  %s27_s27 = ssub.s32 %s1171_s24, %s1235_s25 }
   0xa   : > { %p37_p0 = scmp.ne.s32.totalorder %s1167_s23, %s1163_s22  ;;  %p28_p1 = scmp.eq.s32.totalorder %s27_s27, 0 }
   0xb   : > { %p38_p2 = scmp.eq.s32.totalorder %s1171_s24, 0  ;;  %p937_p4 = scmp.lt.s32.totalorder %s1171_s24, 2 }
   0xc   : > { %s1246_s28 = scalar_select %p28_p1, %s1167_s23, %s30_s26  }
   0xd   : > { %p39_p5 = por %p38_p2, %p37_p0  ;;  %s225_s29 = sand.u32 1, %s1171_s24  }
   0xe   : > { %1497 = sst [smem:[#allocation14_spill]] %s1246_s28  ;;  %s227_s30 = sand.u32 1, %s1167_s23  }
   0xf   : > { %s817_s7 = sshll.u32 %s227_s30, 5  ;;  %s866_s8 = sshll.u32 %s1171_s24, 9 }
  0x10   : > { %s1498_s0 = sld [smem:[#allocation15_spill]]  ;;  %s229_s12 = scalar_lea.vmem [#allocation2], %s817_s7 }
  0x11   : > { %s237_s13 = sshll.u32 %s229_s12, 4  ;;  %p1259_p6 = pnand %p937_p4, %p39_p5  ;;  %s1263_s13 = int_to_ptr.vmem [resolvable:$true] %s237_s13 }
  0x12   : > { %s1265_s15 = sshll.u32 %s227_s30, 3  ;;  %s1267_s16 = scalar_lea.sflag [#allocation3], %s225_s29 }
  0x13   : > { %s1499_s14 = scalar_select %p1259_p6, 1, 0 }
  0x14   : > { %p1489_p8 = pneg %p1259_p6 }
  0x16   : > { %s1257_s11 = scalar_lea.hbm %s1498_s0, %s866_s8  ;;  %s1014_s20 = scalar_lea.hbm %s1498_s0, 1024 }
  0x17   : > { %s1009_s17 = scalar_lea.hbm %s1257_s11, 512  ;;  %p1015_p11 = scmp.lt.u32.totalorder %s1257_s11, %s1498_s0 }
  0x18   : > { %p1010_p7 = scmp.ne.s32.totalorder %s1257_s11, %s1009_s17  ;;  %p1016_p12 = scmp.lt.u32.totalorder %s1014_s20, %s1009_s17 }
  0x19   : > { %p1018_p1 = scmp.lt.u32.totalorder %s1009_s17, %s1257_s11 }
  0x1a   : > { %p1012_p9 = pnand %p1489_p8, %p1010_p7  ;;  %p1017_p13 = por %p1016_p12, %p1015_p11 }
  0x1c   : > { %p1013_p10 = pneg %p1012_p9  ;;  %p1019_p2 = por %p1018_p1, %p1017_p13 }
  0x1e   : > { %p1020_p4 = pnand %p1019_p2, %p1013_p10 }
  0x20   : > { %1023 = shalt.err (!%p1020_p4)
}
  0x21   : > { %s1024_s29 = scalar_lea.vmem %s1263_s13, 512  ;;  %s1173_s30 = smov [#allocation2]  }
  0x22   : > { %p1025_p5 = scmp.ne.s32.totalorder %s1263_s13, %s1024_s29  ;;  %s1029_s7 = sshll.u32 %s1173_s30, 4  ;;  %s1030_s7 = int_to_ptr.vmem [resolvable:$false] %s1029_s7 }
  0x23   : > { %s1031_s8 = scalar_lea.vmem %s1030_s7, 1024  ;;  %p1032_p3 = scmp.lt.s32.totalorder %s1263_s13, %s1030_s7 }
  0x24   : > { %p1027_p7 = pnand %p1025_p5, %p1489_p8  ;;  %p1033_p11 = scmp.lt.s32.totalorder %s1031_s8, %s1024_s29 }
  0x26   : > { %p1028_p9 = pneg %p1027_p7  ;;  %p1034_p12 = por %p1033_p11, %p1032_p3 }
  0x28   : > { %p1035_p13 = pnand %p1034_p12, %p1028_p9 }
  0x2a   : > { %1038 = shalt.err (!%p1035_p13)
}
  0x2b   : > { %928 = dma.hbm_to_vmem [thread:$0]  (!%p1259_p6), %s1257_s11, 512, %s1263_s13, %s1267_s16  }
  0x2c   : > { %s1296_s9 = sadd.s32 4294967295, %s1171_s24   ;;  %s813_s10 = sadd.s32 4294967294, %s1171_s24  }
  0x2d   : > { %p43_p3 = scmp.ne.s32.totalorder %s1163_s22, %s1159_s21  ;;  %p1488_p10 = scmp.eq.s32.totalorder %s1296_s9, 0 }
  0x2e   : > { %p177_p1 = scmp.eq.s32.totalorder %s1296_s9, 1  ;;  %p183_p2 = scmp.eq.s32.totalorder %s813_s10, 1 }
  0x2f   : > { %p814_p4 = scmp.ge.s32.totalorder %s1171_s24, 1  ;;  %p1306_p5 = por %p1488_p10, %p43_p3 }
  0x30   : > { %p1313_p7 = por %p177_p1, %p37_p0  ;;  %p1317_p9 = por %p183_p2, %p43_p3 }
  0x31   : > { %s1500_s12 = scalar_select %p1306_p5, 1, 0 }
  0x32   : > { %s1501_s11 = scalar_select %p1313_p7, 1, 0 }
  0x33   : > { %s1502_s13 = scalar_select %p1317_p9, 1, 0 }
  0x34   : > { %p190_p11 = scmp.lt.s32.totalorder %s1171_s24, 3  ;;  %s1174_s18 = smov [#allocation5]  }
  0x35   : > { %s202_s19 = sshll.u32 %s1174_s18, 4  ;;  %s821_s20 = sshll.u32 %s1171_s24, 7  ;;  %s1326_s19 = int_to_ptr.vmem [resolvable:$true] %s202_s19 }
  0x36   : > { %p1322_p12 = pnand %p814_p4, %p190_p11  ;;  %s1340_s30 = scalar_lea.hbm %s1483_s3, %s821_s20 }
  0x37   : > { %s248_s7 = scalar_lea.vmem [#allocation7], %s1265_s15  ;;  %s1039_s0 = scalar_lea.hbm %s1481_s1, 4096 }
  0x38   : > { %s1503_s17 = scalar_select %p1322_p12, 1, 0 }
  0x39   : > { %p921_p13 = pneg %p1322_p12  ;;  %s255_s8 = sshll.u32 %s248_s7, 4  ;;  %s1343_s8 = int_to_ptr.vmem [resolvable:$true] %s255_s8 }
  0x3a   : > { %p1040_p3 = scmp.ne.s32.totalorder %s1481_s1, %s1039_s0  ;;  %p1046_p11 = scmp.lt.u32.totalorder %s1039_s0, %s1481_s1 }
  0x3b   : > { %p1333_p0 = pnand %p921_p13, %p1488_p10 }
  0x3d   : > { %p1041_p1 = pneg %p1333_p0 }
  0x3f   : > { %p1042_p2 = pnand %p1041_p1, %p1040_p3 }
  0x41   : > { %p1043_p4 = pneg %p1042_p2 }
  0x43   : > { %p1048_p13 = pnand %p1046_p11, %p1043_p4 }
  0x45   : > { %1051 = shalt.err (!%p1048_p13)
}
  0x46   : > { %s1052_s15 = scalar_lea.vmem %s1326_s19, 4096  ;;  %p1060_p7 = scmp.lt.s32.totalorder %s1326_s19, %s1326_s19 }
  0x47   : > { %p1053_p10 = scmp.ne.s32.totalorder %s1326_s19, %s1052_s15  ;;  %p1061_p5 = scmp.lt.s32.totalorder %s1052_s15, %s1052_s15 }
  0x49   : > { %p1055_p8 = pnand %p1053_p10, %p1041_p1  ;;  %p1062_p12 = por %p1061_p5, %p1060_p7 }
  0x4b   : > { %p1056_p9 = pneg %p1055_p8 }
  0x4d   : > { %p1063_p6 = pnand %p1062_p12, %p1056_p9 }
  0x4f   : > { %1066 = shalt.err (!%p1063_p6)
}
  0x50   : > { %s1175_s23 = smov 64   ;;  %s1176_s0 = smov 4  }
  0x51   : > { %924 = dma.hbm_to_vmem [thread:$0]  (!%p1333_p0), %s1481_s1, 4096, %s1326_s19, [#allocation6], %s1175_s23, %s1175_s23, %s1176_s0  }
  0x52   : > { %s1067_s7 = scalar_lea.hbm %s1340_s30, 128  ;;  %p1505_p10 = scmp.ne.s32.totalorder %s1499_s14, 0 }
  0x53   : > { %p1068_p8 = scmp.ne.s32.totalorder %s1340_s30, %s1067_s7  ;;  %s1072_s27 = scalar_lea.hbm %s1483_s3, 256 }
  0x54   : > { %p1506_p5 = pneg %p1505_p10  ;;  %p1073_p9 = scmp.lt.u32.totalorder %s1340_s30, %s1483_s3 }
  0x55   : > { %p1074_p12 = scmp.lt.u32.totalorder %s1072_s27, %s1067_s7  ;;  %p1076_p1 = scmp.lt.u32.totalorder %s1067_s7, %s1340_s30 }
  0x56   : > { %p1070_p7 = pnand %p1068_p8, %p1506_p5 }
  0x57   : > { %p1075_p3 = por %p1074_p12, %p1073_p9 }
  0x58   : > { %p1071_p6 = pneg %p1070_p7 }
  0x59   : > { %p1077_p2 = por %p1076_p1, %p1075_p3 }
  0x5b   : > { %p1078_p4 = pnand %p1077_p2, %p1071_p6 }
  0x5d   : > { %1081 = shalt.err (!%p1078_p4)
}
  0x5e   : > { %s1082_s19 = scalar_lea.vmem %s1343_s8, 128  ;;  %p1507_p11 = pmov %p1506_p5 }
  0x5f   : > { %p1083_p0 = scmp.ne.s32.totalorder %s1343_s8, %s1082_s19  ;;  %s1177_s26 = smov [#allocation7]  }
  0x60   : > { %s1087_s23 = sshll.u32 %s1177_s26, 4  ;;  %s1088_s23 = int_to_ptr.vmem [resolvable:$false] %s1087_s23 }
  0x61   : > { %p1085_p13 = pnand %p1083_p0, %p1507_p11  ;;  %s1089_s0 = scalar_lea.vmem %s1088_s23, 256 }
  0x62   : > { %p1090_p5 = scmp.lt.s32.totalorder %s1343_s8, %s1088_s23  ;;  %p1091_p7 = scmp.lt.s32.totalorder %s1089_s0, %s1082_s19 }
  0x63   : > { %p1086_p8 = pneg %p1085_p13 }
  0x64   : > { %p1092_p9 = por %p1091_p7, %p1090_p5 }
  0x66   : > { %p1093_p12 = pnand %p1092_p9, %p1086_p8 }
  0x68   : > { %1096 = shalt.err (!%p1093_p12)
}
  0x69   : > { %931 = dma.hbm_to_vmem [thread:$0]  (!%p1505_p10), %s1340_s30, 128, %s1343_s8, %s1267_s16  }
  0x6a   : > { %p1508_p6 = scmp.ne.s32.totalorder %s1503_s17, 0 }
  0x6b   : > { %s266_s28 = sand.u32 (!%p1508_p6), 1, %s1296_s9   ;;  %s1394_s20 = sand.u32 (!%p1508_p6), 1, %s1163_s22  }
  0x6c   : > { %264 = sbr.rel (%p1508_p6) target bundleno = 702 (0x2be), region = 44  ;;  %s823_s7 = sshll.u32 (!%p1508_p6), %s1394_s20, 5 }
  0x6d   : > { %s267_s10 = scalar_lea.sflag (!%p1508_p6), [#allocation3], %s266_s28  ;;  %s1397_s18 = scalar_lea.vmem (!%p1508_p6), [#allocation2], %s823_s7 }
  0x6e   : > { %p1509_p3 = scmp.ne.s32.totalorder (!%p1508_p6), %s1500_s12, 0 }
  0x73   : > { %1142 = dma.done.wait (%p1509_p3), %s267_s10, 512  }
  0x74   : > { %1144 = vsyncadd (%p1509_p3), %s267_s10, 4294966784  ;;  %p1510_p10 = scmp.eq.s32.totalorder %s1296_s9, 0 }
  0x76   : > { %1146 = dma.done.wait (%p1510_p10), [#allocation6], 4096   ;;  %p1511_p1 = pmov %p1510_p10 }
  0x77   : > { %s825_s14 = sshll.u32 %s1394_s20, 3 }
  0x78   : > { %1148 = vsyncadd (%p1511_p1), [#allocation6], 4294963200  ;;  %s1410_s16 = scalar_lea.vmem [#allocation7], %s825_s14 }
  0x79   : > { %1150 = dma.done.wait (%p1509_p3), %s267_s10, 128  }
  0x7a   : > { %1152 = vsyncadd (%p1509_p3), %s267_s10, 4294967168  ;;  %v975_v0 = vld [vmem:[#allocation5 + $0x40] sm:$0xff]   ;;  %v979_v4 = vld [vmem:[#allocation5 + $0x48] sm:$0xff]   ;;  %s863_s15 = sshll.u32 %s1296_s9, 7  ;;  %s316_s19 = scalar_lea.vmem [#allocation8], %s825_s14 }
  0x7b   : > { %v976_v1 = vld [vmem:[#allocation5 + $0xc0] sm:$0xff]   ;;  %867 = vmatprep.subr.bf16.mxu0 %v975_v0  ;;  %v980_v5 = vld [vmem:[#allocation5 + $0xc8] sm:$0xff]   ;;  %v983_v8 = vld [vmem:[#allocation5 + $0x50] sm:$0xff]   ;;  %s713_s26 = sshll.u32 %s316_s19, 4  ;;  %s1436_s28 = scalar_lea.hbm %s1486_s6, %s863_s15  ;;  %s1438_s26 = int_to_ptr.vmem [resolvable:$true] %s713_s26 }
  0x7c   : > { %v977_v2 = vld [vmem:[#allocation5] sm:$0xff]   ;;  %889 = vmatprep.subr.bf16.mxu1 %v976_v1  ;;  %v981_v6 = vld [vmem:[#allocation5 + $0x8] sm:$0xff]   ;;  %v984_v9 = vld [vmem:[#allocation5 + $0xd0] sm:$0xff]   ;;  %s700_s7 = scalar_lea.sflag [#allocation4], %s1394_s20  ;;  %s1097_s10 = scalar_lea.vmem %s1438_s26, 128 }
  0x7d   : > { %v978_v3 = vld [vmem:[#allocation5 + $0x80] sm:$0xff]   ;;  %868 = vmatpush3.bf16.msra.mxu0 %v977_v2  ;;  %v982_v7 = vld [vmem:[#allocation5 + $0x88] sm:$0xff]   ;;  %v985_v10 = vld [vmem:[#allocation5 + $0x10] sm:$0xff]   ;;  %p1098_p2 = scmp.ne.s32.totalorder %s1438_s26, %s1097_s10  ;;  %p1512_p4 = scmp.ne.s32.totalorder %s1501_s11, 0 }
  0x7e   : > { %890 = vmatpush3.bf16.msra.mxu1 %v978_v3  ;;  %869 = vmatprep.subr.bf16.mxu0 %v979_v4  ;;  %v986_v11 = vld [vmem:[#allocation5 + $0x90] sm:$0xff]   ;;  %v987_v12 = vld [vmem:[#allocation5 + $0x58] sm:$0xff]   ;;  %v991_v16 = vld [vmem:[#allocation5 + $0x60] sm:$0xff]   ;;  %s1178_s9 = smov [#allocation8]  }
  0x7f   : > { %891 = vmatprep.subr.bf16.mxu1 %v980_v5  ;;  %v988_v13 = vld [vmem:[#allocation5 + $0xd8] sm:$0xff]   ;;  %v992_v17 = vld [vmem:[#allocation5 + $0xe0] sm:$0xff]   ;;  %v995_v20 = vld [vmem:[#allocation5 + $0x68] sm:$0xff]   ;;  %p1099_p0 = pnand %p1098_p2, %p1512_p4 }
  0x80   : > { %v989_v14 = vld [vmem:[#allocation5 + $0x18] sm:$0xff]   ;;  %v993_v18 = vld [vmem:[#allocation5 + $0x20] sm:$0xff]   ;;  %v996_v21 = vld [vmem:[#allocation5 + $0xe8] sm:$0xff]  }
  0x81   : > { %870 = vmatpush3.bf16.msra.mxu0 %v981_v6  ;;  %v990_v15 = vld [vmem:[#allocation5 + $0x98] sm:$0xff]   ;;  %v994_v19 = vld [vmem:[#allocation5 + $0xa0] sm:$0xff]   ;;  %v997_v22 = vld [vmem:[#allocation5 + $0x28] sm:$0xff]   ;;  %p1100_p11 = pneg %p1099_p0 }
  0x82   : > { %892 = vmatpush3.bf16.msra.mxu1 %v982_v7  ;;  %871 = vmatprep.subr.bf16.mxu0 %v983_v8  ;;  %v998_v23 = vld [vmem:[#allocation5 + $0xa8] sm:$0xff]   ;;  %v999_v24 = vld [vmem:[#allocation5 + $0x70] sm:$0xff]   ;;  %v1003_v28 = vld [vmem:[#allocation5 + $0x78] sm:$0xff]  }
  0x83   : > { %893 = vmatprep.subr.bf16.mxu1 %v984_v9  ;;  %v1000_v25 = vld [vmem:[#allocation5 + $0xf0] sm:$0xff]   ;;  %v1004_v29 = vld [vmem:[#allocation5 + $0xf8] sm:$0xff]   ;;  %v386_v32 = vld [vmem:[%s1397_s18 + $0x8] sm:$0xff] }
  0x84   : > { %v1001_v26 = vld [vmem:[#allocation5 + $0x30] sm:$0xff]   ;;  %v1005_v30 = vld [vmem:[#allocation5 + $0x38] sm:$0xff]   ;;  %v385_v34 = vld [vmem:[%s1397_s18] sm:$0xff]  ;;  %v390_v35 = vpack.c.bf16 %v386_v32, %v386_v32 }
  0x85   : > { %872 = vmatpush3.bf16.msra.mxu0 %v985_v10  ;;  %v1002_v27 = vld [vmem:[#allocation5 + $0xb0] sm:$0xff]   ;;  %v1006_v31 = vld [vmem:[#allocation5 + $0xb8] sm:$0xff]   ;;  %v389_v37 = vpack.c.bf16 %v385_v34, %v385_v34  ;;  %v827_v42 = vld [vmem:[%s1482_s2] ss:$0 sm:$0xff] }
  0x86   : > { %894 = vmatpush3.bf16.msra.mxu1 %v986_v11  ;;  %873 = vmatprep.subr.bf16.mxu0 %v987_v12  ;;  %v388_v33 = vld [vmem:[%s1397_s18 + $0x18] sm:$0xff]  ;;  %v387_v38 = vld [vmem:[%s1397_s18 + $0x10] sm:$0xff]  ;;  %v671_v52 = vld [vmem:[%s1410_s16] sm:$0xff]  ;;  %s1101_s18 = sshll.u32 %s1178_s9, 4  ;;  %s1102_s18 = int_to_ptr.vmem [resolvable:$false] %s1101_s18 }
  0x87   : > { %895 = vmatprep.subr.bf16.mxu1 %v988_v13  ;;  %v392_v36 = vpack.c.bf16 %v388_v33, %v388_v33  ;;  %v391_v39 = vpack.c.bf16 %v387_v38, %v387_v38  ;;  %623 = vmatprep.mubr.bf16.mxu0 %v390_v35  ;;  %v860_v63 = vld [vmem:[%s1484_s4] ss:$0 sm:$0xff]  ;;  %s1103_s14 = scalar_lea.vmem %s1102_s18, 256  ;;  %p1104_p13 = scmp.lt.s32.totalorder %s1438_s26, %s1102_s18 }
  0x88   : > { %v861_v1 = vld [vmem:[%s1485_s5] ss:$0 sm:$0xff]  ;;  %p1105_p8 = scmp.lt.s32.totalorder %s1103_s14, %s1097_s10 }
  0x89   : > { %874 = vmatpush3.bf16.msra.mxu0 %v989_v14  ;;  %663 = vmatprep.mubr.bf16.mxu1 %v392_v36 }
  0x8a   : > { %896 = vmatpush3.bf16.msra.mxu1 %v990_v15  ;;  %875 = vmatprep.subr.bf16.mxu0 %v991_v16  ;;  %p1106_p5 = por %p1105_p8, %p1104_p13 }
  0x8b   : > { %897 = vmatprep.subr.bf16.mxu1 %v992_v17 }
  0x8c   : > { %p1107_p7 = pnand %p1106_p5, %p1100_p11 }
  0x8d   : > { %876 = vmatpush3.bf16.msra.mxu0 %v993_v18 }
  0x8e   : > { %898 = vmatpush3.bf16.msra.mxu1 %v994_v19  ;;  %877 = vmatprep.subr.bf16.mxu0 %v995_v20 }
  0x8f   : > { %899 = vmatprep.subr.bf16.mxu1 %v996_v21 }
  0x91   : > { %878 = vmatpush3.bf16.msra.mxu0 %v997_v22 }
  0x92   : > { %900 = vmatpush3.bf16.msra.mxu1 %v998_v23  ;;  %879 = vmatprep.subr.bf16.mxu0 %v999_v24 }
  0x93   : > { %901 = vmatprep.subr.bf16.mxu1 %v1000_v25 }
  0x95   : > { %880 = vmatpush3.bf16.msra.mxu0 %v1001_v26 }
  0x96   : > { %902 = vmatpush3.bf16.msra.mxu1 %v1002_v27  ;;  %881 = vmatprep.subr.bf16.mxu0 %v1003_v28 }
  0x97   : > { %903 = vmatprep.subr.bf16.mxu1 %v1004_v29 }
  0x99   : > { %882 = vmatpush3.bf16.msra.mxu0 %v1005_v30 }
  0x9a   : > { %904 = vmatpush3.bf16.msra.mxu1 %v1006_v31 }
  0x9c   : > { %624 = vmatmul.mubr.bf16.vlgmr.msra.gmra.mrb[0].mxu0 %v389_v37 }
  0x9d   : > { %664 = vmatmul.mubr.bf16.vlgmr.msra.gmra.mrb[0].mxu1 %v391_v39 }
 0x16f   : > { %v883_v40 = vpop.f32.mrb[0].mxu0 }
 0x170   : > { %v905_v41 = vpop.f32.mrb[0].mxu1  ;;  %v884_v43 = vpop.f32.mrb[1].mxu0 }
 0x171   : > { %v906_v44 = vpop.f32.mrb[1].mxu1  ;;  %v885_v45 = vadd.f32 %v884_v43, %v883_v40  ;;  %v886_v47 = vpop.f32.mrb[2].mxu0 }
 0x172   : > { %v907_v46 = vadd.f32 %v906_v44, %v905_v41  ;;  %v908_v48 = vpop.f32.mrb[2].mxu1  ;;  %v887_v49 = vpop.f32.mrb[3].mxu0 }
 0x173   : > { %v909_v50 = vpop.f32.mrb[3].mxu1  ;;  %v626_v51 = vadd.f32 %v885_v45, %v827_v42 }
 0x175   : > { %v666_v53 = vadd.f32 %v907_v46, %v626_v51 }
 0x177   : > { %v672_v54 = vadd.f32 %v671_v52, %v666_v53 }
 0x179   : > { %673 = vadd.xlane.f32.xlu0 %v672_v54 }
 0x206   : > { %v674_v55 = vpop.xlane.xlu0 %673 }
 0x207   : > { %v675_v56 = vmul.f32 0.0078125, %v674_v55 }
 0x209   : > { %v676_v57 = vsub.f32 %v672_v54, %v675_v56 }
 0x20b   : > { %v677_v58 = vmul.f32 %v676_v57, %v676_v57 }
 0x20d   : > { %678 = vadd.xlane.f32.xlu0 %v677_v58 }
 0x29a   : > { %v679_v59 = vpop.xlane.xlu0 %678 }
 0x29b   : > { %v680_v60 = vmul.f32 0.0078125, %v679_v59 }
 0x29d   : > { %v681_v61 = vadd.f32 1e-12, %v680_v60 }
 0x29f   : > { %1007 = vrsqrt.f32 %v681_v61 }
 0x2a9   : > { %v1008_v62 = vpop.eup %1007 }
 0x2aa   : > { %v683_v0 = vmul.f32 %v1008_v62, %v676_v57 }
 0x2ac   : > { %v690_v2 = vmul.f32 %v860_v63, %v683_v0 }
 0x2ae   : > { %v697_v3 = vadd.f32 %v861_v1, %v690_v2 }
 0x2b0   : > { %698 = vst [vmem:[%s316_s19] sm:$0xff] %v697_v3 }
 0x2b1   : > { %1110 = shalt.err (!%p1107_p7)
}
 0x2b2   : > { %s1111_s20 = scalar_lea.hbm %s1436_s28, 128  ;;  %s1115_s17 = scalar_lea.hbm %s1486_s6, 256 }
 0x2b3   : > { %p1112_p9 = scmp.ne.s32.totalorder %s1436_s28, %s1111_s20  ;;  %p1116_p3 = scmp.lt.u32.totalorder %s1436_s28, %s1486_s6 }
 0x2b4   : > { %p1117_p10 = scmp.lt.u32.totalorder %s1115_s17, %s1111_s20  ;;  %p1119_p2 = scmp.lt.u32.totalorder %s1111_s20, %s1436_s28 }
 0x2b5   : > { %p1113_p12 = pnand %p1112_p9, %p1512_p4 }
 0x2b6   : > { %p1118_p1 = por %p1117_p10, %p1116_p3 }
 0x2b7   : > { %p1114_p6 = pneg %p1113_p12 }
 0x2b8   : > { %p1120_p0 = por %p1119_p2, %p1118_p1 }
 0x2ba   : > { %p1121_p11 = pnand %p1120_p0, %p1114_p6 }
 0x2bc   : > { %1124 = shalt.err (!%p1121_p11)
}
 0x2bd   : > { %919 = dma.vmem_to_hbm [thread:$0]  (%p1512_p4), %s1438_s26, 128, %s1436_s28, %s700_s7  }
 0x2be PF: > { %s725_s27 = sand.u32 1, %s1159_s21   ;;  %p1513_p13 = scmp.ne.s32.totalorder %s1502_s13, 0 }
 0x2bf   : > { %p1514_p8 = scmp.ge.s32.totalorder %s1171_s24, 2  ;;  %s726_s29 = scalar_lea.sflag [#allocation4], %s725_s27 }
 0x2c1   : > { %p933_p5 = pnand %p1514_p8, %p1513_p13 }
 0x2c3   : > { %1154 = dma.done.wait (!%p933_p5), %s726_s29, 128  }
 0x2c4   : > { %1156 = vsyncadd (!%p933_p5), %s726_s29, 4294967168  ;;  %s1515_s15 = sld [smem:[#allocation13_spill]]  ;;  %s1516_s23 = sld [smem:[#allocation14_spill]] }
 0x2c5   : > { %p20_p7 = scmp.ge.s32.totalorder %s1235_s25, 4   ;;  %s1517_s21 = smov %s1163_s22 }
 0x2c6   : > { %s1519_s24 = smov %s1235_s25 }
 0x2c7   :  { %22 = sbr.rel (!%p20_p7) target bundleno = 8 (0x8), region = 104 }
 0x2ca   : > { %s1518_s22 = smov %s1515_s15 }
 0x2ce   :  { %731 = vsyncpa [#allocation3], 1 }
 0x2cf   :  { %733 = vsyncpa [#allocation3 + $0x1], 1 }
 0x2d0   :  { %734 = vsyncpa [#allocation6], 1 }
 0x2d1   :  { %735 = vsyncpa [#allocation4], 1 }
 0x2d2   :  { %737 = vsyncpa [#allocation4 + $0x1], 1 }

// kernel: tpu_custom_call.1
= control target key start
LH: loop header
LB: loop body
LE: loop exit
PB: predicated region body
PF: predicated region fallthrough
CT: control target
= control target key end

     0   :  { %s1480_s0 = inlined_call_operand.hbm [shape: f32[16,512], index: 0, kind: input, shape index: {}]   ;;  %s1481_s1 = inlined_call_operand.hbm [shape: bf16[512,128], index: 1, kind: input, shape index: {}]   ;;  %s1482_s2 = inlined_call_operand.vmem [shape: f32[1,128], index: 2, kind: input, shape index: {}]   ;;  %s1483_s3 = inlined_call_operand.hbm [shape: f32[16,128], index: 3, kind: input, shape index: {}]   ;;  %s1484_s4 = inlined_call_operand.vmem [shape: f32[1,128], index: 4, kind: input, shape index: {}]   ;;  %s1485_s5 = inlined_call_operand.vmem [shape: f32[1,128], index: 5, kind: input, shape index: {}]   ;;  %s1486_s6 = inlined_call_operand.hbm [shape: f32[16,128], index: 6, kind: output, shape index: {}]  }
   0x1   :  { %1495 = sst [smem:[#allocation15_spill]] %s1480_s0 }
   0x2   :  { %11 = vsyncpa [#allocation3], 0 }
   0x3   :  { %13 = vsyncpa [#allocation3 + $0x1], 0 }
   0x4   :  { %14 = vsyncpa [#allocation6], 0 }
   0x5   :  { %15 = vsyncpa [#allocation4], 0 }
   0x6   :  { %17 = vsyncpa [#allocation4 + $0x1], 0  ;;  %s1214_s21 = smov 0   ;;  %s1216_s22 = smov 0  }
   0x7   :  { %s1218_s23 = smov 0   ;;  %s1220_s24 = smov 0  }
   0x8 LB: > { %1496 = sst [smem:[#allocation13_spill]] %s1167_s23  ;;  %s1235_s25 = sadd.s32 1, %s1171_s24   ;;  %s1171_s24 = sphi %s1220_s24, %s1519_s24   ;;  %s1167_s23 = sphi %s1218_s23, %s1516_s23   ;;  %s1163_s22 = sphi %s1216_s22, %s1518_s22   ;;  %s1159_s21 = sphi %s1214_s21, %s1517_s21  }
   0x9   : > { %s30_s26 = sadd.s32 1, %s1167_s23  ;;  %s27_s27 = ssub.s32 %s1171_s24, %s1235_s25 }
   0xa   : > { %p37_p0 = scmp.ne.s32.totalorder %s1167_s23, %s1163_s22  ;;  %p28_p1 = scmp.eq.s32.totalorder %s27_s27, 0 }
   0xb   : > { %p38_p2 = scmp.eq.s32.totalorder %s1171_s24, 0  ;;  %p937_p4 = scmp.lt.s32.totalorder %s1171_s24, 2 }
   0xc   : > { %s1246_s28 = scalar_select %p28_p1, %s1167_s23, %s30_s26  }
   0xd   : > { %p39_p5 = por %p38_p2, %p37_p0  ;;  %s225_s29 = sand.u32 1, %s1171_s24  }
   0xe   : > { %1497 = sst [smem:[#allocation14_spill]] %s1246_s28  ;;  %s227_s30 = sand.u32 1, %s1167_s23  }
   0xf   : > { %s817_s7 = sshll.u32 %s227_s30, 5  ;;  %s866_s8 = sshll.u32 %s1171_s24, 9 }
  0x10   : > { %s1498_s0 = sld [smem:[#allocation15_spill]]  ;;  %s229_s12 = scalar_lea.vmem [#allocation2], %s817_s7 }
  0x11   : > { %s237_s13 = sshll.u32 %s229_s12, 4  ;;  %p1259_p6 = pnand %p937_p4, %p39_p5  ;;  %s1263_s13 = int_to_ptr.vmem [resolvable:$true] %s237_s13 }
  0x12   : > { %s1265_s15 = sshll.u32 %s227_s30, 3  ;;  %s1267_s16 = scalar_lea.sflag [#allocation3], %s225_s29 }
  0x13   : > { %s1499_s14 = scalar_select %p1259_p6, 1, 0 }
  0x14   : > { %p1489_p8 = pneg %p1259_p6 }
  0x16   : > { %s1257_s11 = scalar_lea.hbm %s1498_s0, %s866_s8  ;;  %s1014_s20 = scalar_lea.hbm %s1498_s0, 1024 }
  0x17   : > { %s1009_s17 = scalar_lea.hbm %s1257_s11, 512  ;;  %p1015_p11 = scmp.lt.u32.totalorder %s1257_s11, %s1498_s0 }
  0x18   : > { %p1010_p7 = scmp.ne.s32.totalorder %s1257_s11, %s1009_s17  ;;  %p1016_p12 = scmp.lt.u32.totalorder %s1014_s20, %s1009_s17 }
  0x19   : > { %p1018_p1 = scmp.lt.u32.totalorder %s1009_s17, %s1257_s11 }
  0x1a   : > { %p1012_p9 = pnand %p1489_p8, %p1010_p7  ;;  %p1017_p13 = por %p1016_p12, %p1015_p11 }
  0x1c   : > { %p1013_p10 = pneg %p1012_p9  ;;  %p1019_p2 = por %p1018_p1, %p1017_p13 }
  0x1e   : > { %p1020_p4 = pnand %p1019_p2, %p1013_p10 }
  0x20   : > { %1023 = shalt.err (!%p1020_p4)
}
  0x21   : > { %s1024_s29 = scalar_lea.vmem %s1263_s13, 512  ;;  %s1173_s30 = smov [#allocation2]  }
  0x22   : > { %p1025_p5 = scmp.ne.s32.totalorder %s1263_s13, %s1024_s29  ;;  %s1029_s7 = sshll.u32 %s1173_s30, 4  ;;  %s1030_s7 = int_to_ptr.vmem [resolvable:$false] %s1029_s7 }
  0x23   : > { %s1031_s8 = scalar_lea.vmem %s1030_s7, 1024  ;;  %p1032_p3 = scmp.lt.s32.totalorder %s1263_s13, %s1030_s7 }
  0x24   : > { %p1027_p7 = pnand %p1025_p5, %p1489_p8  ;;  %p1033_p11 = scmp.lt.s32.totalorder %s1031_s8, %s1024_s29 }
  0x26   : > { %p1028_p9 = pneg %p1027_p7  ;;  %p1034_p12 = por %p1033_p11, %p1032_p3 }
  0x28   : > { %p1035_p13 = pnand %p1034_p12, %p1028_p9 }
  0x2a   : > { %1038 = shalt.err (!%p1035_p13)
}
  0x2b   : > { %928 = dma.hbm_to_vmem [thread:$0]  (!%p1259_p6), %s1257_s11, 512, %s1263_s13, %s1267_s16  }
  0x2c   : > { %s1296_s9 = sadd.s32 4294967295, %s1171_s24   ;;  %s813_s10 = sadd.s32 4294967294, %s1171_s24  }
  0x2d   : > { %p43_p3 = scmp.ne.s32.totalorder %s1163_s22, %s1159_s21  ;;  %p1488_p10 = scmp.eq.s32.totalorder %s1296_s9, 0 }
  0x2e   : > { %p177_p1 = scmp.eq.s32.totalorder %s1296_s9, 1  ;;  %p183_p2 = scmp.eq.s32.totalorder %s813_s10, 1 }
  0x2f   : > { %p814_p4 = scmp.ge.s32.totalorder %s1171_s24, 1  ;;  %p1306_p5 = por %p1488_p10, %p43_p3 }
  0x30   : > { %p1313_p7 = por %p177_p1, %p37_p0  ;;  %p1317_p9 = por %p183_p2, %p43_p3 }
  0x31   : > { %s1500_s12 = scalar_select %p1306_p5, 1, 0 }
  0x32   : > { %s1501_s11 = scalar_select %p1313_p7, 1, 0 }
  0x33   : > { %s1502_s13 = scalar_select %p1317_p9, 1, 0 }
  0x34   : > { %p190_p11 = scmp.lt.s32.totalorder %s1171_s24, 3  ;;  %s1174_s18 = smov [#allocation5]  }
  0x35   : > { %s202_s19 = sshll.u32 %s1174_s18, 4  ;;  %s821_s20 = sshll.u32 %s1171_s24, 7  ;;  %s1326_s19 = int_to_ptr.vmem [resolvable:$true] %s202_s19 }
  0x36   : > { %p1322_p12 = pnand %p814_p4, %p190_p11  ;;  %s1340_s30 = scalar_lea.hbm %s1483_s3, %s821_s20 }
  0x37   : > { %s248_s7 = scalar_lea.vmem [#allocation7], %s1265_s15  ;;  %s1039_s0 = scalar_lea.hbm %s1481_s1, 4096 }
  0x38   : > { %s1503_s17 = scalar_select %p1322_p12, 1, 0 }
  0x39   : > { %p921_p13 = pneg %p1322_p12  ;;  %s255_s8 = sshll.u32 %s248_s7, 4  ;;  %s1343_s8 = int_to_ptr.vmem [resolvable:$true] %s255_s8 }
  0x3a   : > { %p1040_p3 = scmp.ne.s32.totalorder %s1481_s1, %s1039_s0  ;;  %p1046_p11 = scmp.lt.u32.totalorder %s1039_s0, %s1481_s1 }
  0x3b   : > { %p1333_p0 = pnand %p921_p13, %p1488_p10 }
  0x3d   : > { %p1041_p1 = pneg %p1333_p0 }
  0x3f   : > { %p1042_p2 = pnand %p1041_p1, %p1040_p3 }
  0x41   : > { %p1043_p4 = pneg %p1042_p2 }
  0x43   : > { %p1048_p13 = pnand %p1046_p11, %p1043_p4 }
  0x45   : > { %1051 = shalt.err (!%p1048_p13)
}
  0x46   : > { %s1052_s15 = scalar_lea.vmem %s1326_s19, 4096  ;;  %p1060_p7 = scmp.lt.s32.totalorder %s1326_s19, %s1326_s19 }
  0x47   : > { %p1053_p10 = scmp.ne.s32.totalorder %s1326_s19, %s1052_s15  ;;  %p1061_p5 = scmp.lt.s32.totalorder %s1052_s15, %s1052_s15 }
  0x49   : > { %p1055_p8 = pnand %p1053_p10, %p1041_p1  ;;  %p1062_p12 = por %p1061_p5, %p1060_p7 }
  0x4b   : > { %p1056_p9 = pneg %p1055_p8 }
  0x4d   : > { %p1063_p6 = pnand %p1062_p12, %p1056_p9 }
  0x4f   : > { %1066 = shalt.err (!%p1063_p6)
}
  0x50   : > { %s1175_s23 = smov 64   ;;  %s1176_s0 = smov 4  }
  0x51   : > { %924 = dma.hbm_to_vmem [thread:$0]  (!%p1333_p0), %s1481_s1, 4096, %s1326_s19, [#allocation6], %s1175_s23, %s1175_s23, %s1176_s0  }
  0x52   : > { %s1067_s7 = scalar_lea.hbm %s1340_s30, 128  ;;  %p1505_p10 = scmp.ne.s32.totalorder %s1499_s14, 0 }
  0x53   : > { %p1068_p8 = scmp.ne.s32.totalorder %s1340_s30, %s1067_s7  ;;  %s1072_s27 = scalar_lea.hbm %s1483_s3, 256 }
  0x54   : > { %p1506_p5 = pneg %p1505_p10  ;;  %p1073_p9 = scmp.lt.u32.totalorder %s1340_s30, %s1483_s3 }
  0x55   : > { %p1074_p12 = scmp.lt.u32.totalorder %s1072_s27, %s1067_s7  ;;  %p1076_p1 = scmp.lt.u32.totalorder %s1067_s7, %s1340_s30 }
  0x56   : > { %p1070_p7 = pnand %p1068_p8, %p1506_p5 }
  0x57   : > { %p1075_p3 = por %p1074_p12, %p1073_p9 }
  0x58   : > { %p1071_p6 = pneg %p1070_p7 }
  0x59   : > { %p1077_p2 = por %p1076_p1, %p1075_p3 }
  0x5b   : > { %p1078_p4 = pnand %p1077_p2, %p1071_p6 }
  0x5d   : > { %1081 = shalt.err (!%p1078_p4)
}
  0x5e   : > { %s1082_s19 = scalar_lea.vmem %s1343_s8, 128  ;;  %p1507_p11 = pmov %p1506_p5 }
  0x5f   : > { %p1083_p0 = scmp.ne.s32.totalorder %s1343_s8, %s1082_s19  ;;  %s1177_s26 = smov [#allocation7]  }
  0x60   : > { %s1087_s23 = sshll.u32 %s1177_s26, 4  ;;  %s1088_s23 = int_to_ptr.vmem [resolvable:$false] %s1087_s23 }
  0x61   : > { %p1085_p13 = pnand %p1083_p0, %p1507_p11  ;;  %s1089_s0 = scalar_lea.vmem %s1088_s23, 256 }
  0x62   : > { %p1090_p5 = scmp.lt.s32.totalorder %s1343_s8, %s1088_s23  ;;  %p1091_p7 = scmp.lt.s32.totalorder %s1089_s0, %s1082_s19 }
  0x63   : > { %p1086_p8 = pneg %p1085_p13 }
  0x64   : > { %p1092_p9 = por %p1091_p7, %p1090_p5 }
  0x66   : > { %p1093_p12 = pnand %p1092_p9, %p1086_p8 }
  0x68   : > { %1096 = shalt.err (!%p1093_p12)
}
  0x69   : > { %931 = dma.hbm_to_vmem [thread:$0]  (!%p1505_p10), %s1340_s30, 128, %s1343_s8, %s1267_s16  }
  0x6a   : > { %p1508_p6 = scmp.ne.s32.totalorder %s1503_s17, 0 }
  0x6b   : > { %s266_s28 = sand.u32 (!%p1508_p6), 1, %s1296_s9   ;;  %s1394_s20 = sand.u32 (!%p1508_p6), 1, %s1163_s22  }
  0x6c   : > { %264 = sbr.rel (%p1508_p6) target bundleno = 702 (0x2be), region = 44  ;;  %s823_s7 = sshll.u32 (!%p1508_p6), %s1394_s20, 5 }
  0x6d   : > { %s267_s10 = scalar_lea.sflag (!%p1508_p6), [#allocation3], %s266_s28  ;;  %s1397_s18 = scalar_lea.vmem (!%p1508_p6), [#allocation2], %s823_s7 }
  0x6e   : > { %p1509_p3 = scmp.ne.s32.totalorder (!%p1508_p6), %s1500_s12, 0 }
  0x73   : > { %1142 = dma.done.wait (%p1509_p3), %s267_s10, 512  }
  0x74   : > { %1144 = vsyncadd (%p1509_p3), %s267_s10, 4294966784  ;;  %p1510_p10 = scmp.eq.s32.totalorder %s1296_s9, 0 }
  0x76   : > { %1146 = dma.done.wait (%p1510_p10), [#allocation6], 4096   ;;  %p1511_p1 = pmov %p1510_p10 }
  0x77   : > { %s825_s14 = sshll.u32 %s1394_s20, 3 }
  0x78   : > { %1148 = vsyncadd (%p1511_p1), [#allocation6], 4294963200  ;;  %s1410_s16 = scalar_lea.vmem [#allocation7], %s825_s14 }
  0x79   : > { %1150 = dma.done.wait (%p1509_p3), %s267_s10, 128  }
  0x7a   : > { %1152 = vsyncadd (%p1509_p3), %s267_s10, 4294967168  ;;  %v975_v0 = vld [vmem:[#allocation5 + $0x40] sm:$0xff]   ;;  %v979_v4 = vld [vmem:[#allocation5 + $0x48] sm:$0xff]   ;;  %s863_s15 = sshll.u32 %s1296_s9, 7  ;;  %s316_s19 = scalar_lea.vmem [#allocation8], %s825_s14 }
  0x7b   : > { %v976_v1 = vld [vmem:[#allocation5 + $0xc0] sm:$0xff]   ;;  %867 = vmatprep.subr.bf16.mxu0 %v975_v0  ;;  %v980_v5 = vld [vmem:[#allocation5 + $0xc8] sm:$0xff]   ;;  %v983_v8 = vld [vmem:[#allocation5 + $0x50] sm:$0xff]   ;;  %s713_s26 = sshll.u32 %s316_s19, 4  ;;  %s1436_s28 = scalar_lea.hbm %s1486_s6, %s863_s15  ;;  %s1438_s26 = int_to_ptr.vmem [resolvable:$true] %s713_s26 }
  0x7c   : > { %v977_v2 = vld [vmem:[#allocation5] sm:$0xff]   ;;  %889 = vmatprep.subr.bf16.mxu1 %v976_v1  ;;  %v981_v6 = vld [vmem:[#allocation5 + $0x8] sm:$0xff]   ;;  %v984_v9 = vld [vmem:[#allocation5 + $0xd0] sm:$0xff]   ;;  %s700_s7 = scalar_lea.sflag [#allocation4], %s1394_s20  ;;  %s1097_s10 = scalar_lea.vmem %s1438_s26, 128 }
  0x7d   : > { %v978_v3 = vld [vmem:[#allocation5 + $0x80] sm:$0xff]   ;;  %868 = vmatpush3.bf16.msra.mxu0 %v977_v2  ;;  %v982_v7 = vld [vmem:[#allocation5 + $0x88] sm:$0xff]   ;;  %v985_v10 = vld [vmem:[#allocation5 + $0x10] sm:$0xff]   ;;  %p1098_p2 = scmp.ne.s32.totalorder %s1438_s26, %s1097_s10  ;;  %p1512_p4 = scmp.ne.s32.totalorder %s1501_s11, 0 }
  0x7e   : > { %890 = vmatpush3.bf16.msra.mxu1 %v978_v3  ;;  %869 = vmatprep.subr.bf16.mxu0 %v979_v4  ;;  %v986_v11 = vld [vmem:[#allocation5 + $0x90] sm:$0xff]   ;;  %v987_v12 = vld [vmem:[#allocation5 + $0x58] sm:$0xff]   ;;  %v991_v16 = vld [vmem:[#allocation5 + $0x60] sm:$0xff]   ;;  %s1178_s9 = smov [#allocation8]  }
  0x7f   : > { %891 = vmatprep.subr.bf16.mxu1 %v980_v5  ;;  %v988_v13 = vld [vmem:[#allocation5 + $0xd8] sm:$0xff]   ;;  %v992_v17 = vld [vmem:[#allocation5 + $0xe0] sm:$0xff]   ;;  %v995_v20 = vld [vmem:[#allocation5 + $0x68] sm:$0xff]   ;;  %p1099_p0 = pnand %p1098_p2, %p1512_p4 }
  0x80   : > { %v989_v14 = vld [vmem:[#allocation5 + $0x18] sm:$0xff]   ;;  %v993_v18 = vld [vmem:[#allocation5 + $0x20] sm:$0xff]   ;;  %v996_v21 = vld [vmem:[#allocation5 + $0xe8] sm:$0xff]  }
  0x81   : > { %870 = vmatpush3.bf16.msra.mxu0 %v981_v6  ;;  %v990_v15 = vld [vmem:[#allocation5 + $0x98] sm:$0xff]   ;;  %v994_v19 = vld [vmem:[#allocation5 + $0xa0] sm:$0xff]   ;;  %v997_v22 = vld [vmem:[#allocation5 + $0x28] sm:$0xff]   ;;  %p1100_p11 = pneg %p1099_p0 }
  0x82   : > { %892 = vmatpush3.bf16.msra.mxu1 %v982_v7  ;;  %871 = vmatprep.subr.bf16.mxu0 %v983_v8  ;;  %v998_v23 = vld [vmem:[#allocation5 + $0xa8] sm:$0xff]   ;;  %v999_v24 = vld [vmem:[#allocation5 + $0x70] sm:$0xff]   ;;  %v1003_v28 = vld [vmem:[#allocation5 + $0x78] sm:$0xff]  }
  0x83   : > { %893 = vmatprep.subr.bf16.mxu1 %v984_v9  ;;  %v1000_v25 = vld [vmem:[#allocation5 + $0xf0] sm:$0xff]   ;;  %v1004_v29 = vld [vmem:[#allocation5 + $0xf8] sm:$0xff]   ;;  %v386_v32 = vld [vmem:[%s1397_s18 + $0x8] sm:$0xff] }
  0x84   : > { %v1001_v26 = vld [vmem:[#allocation5 + $0x30] sm:$0xff]   ;;  %v1005_v30 = vld [vmem:[#allocation5 + $0x38] sm:$0xff]   ;;  %v385_v34 = vld [vmem:[%s1397_s18] sm:$0xff]  ;;  %v390_v35 = vpack.c.bf16 %v386_v32, %v386_v32 }
  0x85   : > { %872 = vmatpush3.bf16.msra.mxu0 %v985_v10  ;;  %v1002_v27 = vld [vmem:[#allocation5 + $0xb0] sm:$0xff]   ;;  %v1006_v31 = vld [vmem:[#allocation5 + $0xb8] sm:$0xff]   ;;  %v389_v37 = vpack.c.bf16 %v385_v34, %v385_v34  ;;  %v827_v42 = vld [vmem:[%s1482_s2] ss:$0 sm:$0xff] }
  0x86   : > { %894 = vmatpush3.bf16.msra.mxu1 %v986_v11  ;;  %873 = vmatprep.subr.bf16.mxu0 %v987_v12  ;;  %v388_v33 = vld [vmem:[%s1397_s18 + $0x18] sm:$0xff]  ;;  %v387_v38 = vld [vmem:[%s1397_s18 + $0x10] sm:$0xff]  ;;  %v671_v52 = vld [vmem:[%s1410_s16] sm:$0xff]  ;;  %s1101_s18 = sshll.u32 %s1178_s9, 4  ;;  %s1102_s18 = int_to_ptr.vmem [resolvable:$false] %s1101_s18 }
  0x87   : > { %895 = vmatprep.subr.bf16.mxu1 %v988_v13  ;;  %v392_v36 = vpack.c.bf16 %v388_v33, %v388_v33  ;;  %v391_v39 = vpack.c.bf16 %v387_v38, %v387_v38  ;;  %623 = vmatprep.mubr.bf16.mxu0 %v390_v35  ;;  %v860_v63 = vld [vmem:[%s1484_s4] ss:$0 sm:$0xff]  ;;  %s1103_s14 = scalar_lea.vmem %s1102_s18, 256  ;;  %p1104_p13 = scmp.lt.s32.totalorder %s1438_s26, %s1102_s18 }
  0x88   : > { %v861_v1 = vld [vmem:[%s1485_s5] ss:$0 sm:$0xff]  ;;  %p1105_p8 = scmp.lt.s32.totalorder %s1103_s14, %s1097_s10 }
  0x89   : > { %874 = vmatpush3.bf16.msra.mxu0 %v989_v14  ;;  %663 = vmatprep.mubr.bf16.mxu1 %v392_v36 }
  0x8a   : > { %896 = vmatpush3.bf16.msra.mxu1 %v990_v15  ;;  %875 = vmatprep.subr.bf16.mxu0 %v991_v16  ;;  %p1106_p5 = por %p1105_p8, %p1104_p13 }
  0x8b   : > { %897 = vmatprep.subr.bf16.mxu1 %v992_v17 }
  0x8c   : > { %p1107_p7 = pnand %p1106_p5, %p1100_p11 }
  0x8d   : > { %876 = vmatpush3.bf16.msra.mxu0 %v993_v18 }
  0x8e   : > { %898 = vmatpush3.bf16.msra.mxu1 %v994_v19  ;;  %877 = vmatprep.subr.bf16.mxu0 %v995_v20 }
  0x8f   : > { %899 = vmatprep.subr.bf16.mxu1 %v996_v21 }
  0x91   : > { %878 = vmatpush3.bf16.msra.mxu0 %v997_v22 }
  0x92   : > { %900 = vmatpush3.bf16.msra.mxu1 %v998_v23  ;;  %879 = vmatprep.subr.bf16.mxu0 %v999_v24 }
  0x93   : > { %901 = vmatprep.subr.bf16.mxu1 %v1000_v25 }
  0x95   : > { %880 = vmatpush3.bf16.msra.mxu0 %v1001_v26 }
  0x96   : > { %902 = vmatpush3.bf16.msra.mxu1 %v1002_v27  ;;  %881 = vmatprep.subr.bf16.mxu0 %v1003_v28 }
  0x97   : > { %903 = vmatprep.subr.bf16.mxu1 %v1004_v29 }
  0x99   : > { %882 = vmatpush3.bf16.msra.mxu0 %v1005_v30 }
  0x9a   : > { %904 = vmatpush3.bf16.msra.mxu1 %v1006_v31 }
  0x9c   : > { %624 = vmatmul.mubr.bf16.vlgmr.msra.gmra.mrb[0].mxu0 %v389_v37 }
  0x9d   : > { %664 = vmatmul.mubr.bf16.vlgmr.msra.gmra.mrb[0].mxu1 %v391_v39 }
 0x16f   : > { %v883_v40 = vpop.f32.mrb[0].mxu0 }
 0x170   : > { %v905_v41 = vpop.f32.mrb[0].mxu1  ;;  %v884_v43 = vpop.f32.mrb[1].mxu0 }
 0x171   : > { %v906_v44 = vpop.f32.mrb[1].mxu1  ;;  %v885_v45 = vadd.f32 %v884_v43, %v883_v40  ;;  %v886_v47 = vpop.f32.mrb[2].mxu0 }
 0x172   : > { %v907_v46 = vadd.f32 %v906_v44, %v905_v41  ;;  %v908_v48 = vpop.f32.mrb[2].mxu1  ;;  %v887_v49 = vpop.f32.mrb[3].mxu0 }
 0x173   : > { %v909_v50 = vpop.f32.mrb[3].mxu1  ;;  %v626_v51 = vadd.f32 %v885_v45, %v827_v42 }
 0x175   : > { %v666_v53 = vadd.f32 %v907_v46, %v626_v51 }
 0x177   : > { %v672_v54 = vadd.f32 %v671_v52, %v666_v53 }
 0x179   : > { %673 = vadd.xlane.f32.xlu0 %v672_v54 }
 0x206   : > { %v674_v55 = vpop.xlane.xlu0 %673 }
 0x207   : > { %v675_v56 = vmul.f32 0.0078125, %v674_v55 }
 0x209   : > { %v676_v57 = vsub.f32 %v672_v54, %v675_v56 }
 0x20b   : > { %v677_v58 = vmul.f32 %v676_v57, %v676_v57 }
 0x20d   : > { %678 = vadd.xlane.f32.xlu0 %v677_v58 }
 0x29a   : > { %v679_v59 = vpop.xlane.xlu0 %678 }
 0x29b   : > { %v680_v60 = vmul.f32 0.0078125, %v679_v59 }
 0x29d   : > { %v681_v61 = vadd.f32 1e-12, %v680_v60 }
 0x29f   : > { %1007 = vrsqrt.f32 %v681_v61 }
 0x2a9   : > { %v1008_v62 = vpop.eup %1007 }
 0x2aa   : > { %v683_v0 = vmul.f32 %v1008_v62, %v676_v57 }
 0x2ac   : > { %v690_v2 = vmul.f32 %v860_v63, %v683_v0 }
 0x2ae   : > { %v697_v3 = vadd.f32 %v861_v1, %v690_v2 }
 0x2b0   : > { %698 = vst [vmem:[%s316_s19] sm:$0xff] %v697_v3 }
 0x2b1   : > { %1110 = shalt.err (!%p1107_p7)
}
 0x2b2   : > { %s1111_s20 = scalar_lea.hbm %s1436_s28, 128  ;;  %s1115_s17 = scalar_lea.hbm %s1486_s6, 256 }
 0x2b3   : > { %p1112_p9 = scmp.ne.s32.totalorder %s1436_s28, %s1111_s20  ;;  %p1116_p3 = scmp.lt.u32.totalorder %s1436_s28, %s1486_s6 }
 0x2b4   : > { %p1117_p10 = scmp.lt.u32.totalorder %s1115_s17, %s1111_s20  ;;  %p1119_p2 = scmp.lt.u32.totalorder %s1111_s20, %s1436_s28 }
 0x2b5   : > { %p1113_p12 = pnand %p1112_p9, %p1512_p4 }
 0x2b6   : > { %p1118_p1 = por %p1117_p10, %p1116_p3 }
 0x2b7   : > { %p1114_p6 = pneg %p1113_p12 }
 0x2b8   : > { %p1120_p0 = por %p1119_p2, %p1118_p1 }
 0x2ba   : > { %p1121_p11 = pnand %p1120_p0, %p1114_p6 }
 0x2bc   : > { %1124 = shalt.err (!%p1121_p11)
}
 0x2bd   : > { %919 = dma.vmem_to_hbm [thread:$0]  (%p1512_p4), %s1438_s26, 128, %s1436_s28, %s700_s7  }
 0x2be PF: > { %s725_s27 = sand.u32 1, %s1159_s21   ;;  %p1513_p13 = scmp.ne.s32.totalorder %s1502_s13, 0 }
 0x2bf   : > { %p1514_p8 = scmp.ge.s32.totalorder %s1171_s24, 2  ;;  %s726_s29 = scalar_lea.sflag [#allocation4], %s725_s27 }
 0x2c1   : > { %p933_p5 = pnand %p1514_p8, %p1513_p13 }
 0x2c3   : > { %1154 = dma.done.wait (!%p933_p5), %s726_s29, 128  }
 0x2c4   : > { %1156 = vsyncadd (!%p933_p5), %s726_s29, 4294967168  ;;  %s1515_s15 = sld [smem:[#allocation13_spill]]  ;;  %s1516_s23 = sld [smem:[#allocation14_spill]] }
 0x2c5   : > { %p20_p7 = scmp.ge.s32.totalorder %s1235_s25, 4   ;;  %s1517_s21 = smov %s1163_s22 }
 0x2c6   : > { %s1519_s24 = smov %s1235_s25 }
 0x2c7   :  { %22 = sbr.rel (!%p20_p7) target bundleno = 8 (0x8), region = 104 }
 0x2ca   : > { %s1518_s22 = smov %s1515_s15 }
 0x2ce   :  { %731 = vsyncpa [#allocation3], 1 }
 0x2cf   :  { %733 = vsyncpa [#allocation3 + $0x1], 1 }
 0x2d0   :  { %734 = vsyncpa [#allocation6], 1 }
 0x2d1   :  { %735 = vsyncpa [#allocation4], 1 }
 0x2d2   :  { %737 = vsyncpa [#allocation4 + $0x1], 1 }

</bundles_post_ra>
